<compile_context>
chip_gen: v5e
topology: v5e:2x2
jax: 0.10.0
libtpu: 0.0.40
codegen_flags: <defaults>
</compile_context>

<pallas_src>
import math

import jax
import jax.numpy as jnp
from jax import lax
from jax.experimental import pallas as pl
from jax.experimental.pallas import tpu as pltpu

LANE = 128


def _round_up(x, m):
    return ((x + m - 1) // m) * m


def _vmem_capacity_bytes():
    """Per-core VMEM capacity; conservative 64 MiB fallback (v7x)."""
    try:
        info = pltpu.get_tpu_info()
        cap = getattr(info, "vmem_capacity_bytes", None)
        if cap:
            return int(cap)
    except Exception:
        pass
    return 64 * 1024 * 1024


# ---------------- Kernel A: A_hat VMEM-resident (small / medium graphs) -----

def _make_resident_kernel(tm, num_classes, num_layers, return_embeds):
    """Grid (layer, row_tile); A_hat, H and XW live in VMEM scratch."""

    def kernel(x_hbm, a_hbm, w_ref, b_ref, o_ref, h_ref, xw_ref, a_res, dma_sem):
        l = pl.program_id(0)          # layer (outermost, sequential dependency)
        i = pl.program_id(1)          # output row tile
        row0 = pl.multiple_of(i * tm, tm)

        # One-time setup: DMA padded X and A_hat from HBM straight into the
        # resident scratch slabs (A is read from HBM exactly once).
        @pl.when((l == 0) & (i == 0))
        def _():
            cx = pltpu.make_async_copy(x_hbm, h_ref, dma_sem.at[0])
            ca = pltpu.make_async_copy(a_hbm, a_res, dma_sem.at[1])
            cx.start()
            ca.start()
            cx.wait()
            ca.wait()

        # Per layer: XW = H @ W (nothing to overlap with - A is already in
        # VMEM - so a single matmul per layer is fine here).
        @pl.when(i == 0)
        def _():
            xw_ref[...] = jnp.dot(
                h_ref[...], w_ref[0], preferred_element_type=jnp.float32
            ).astype(xw_ref.dtype)

        # Aggregation for this row tile: full reduction in one MXU dot
        # (f32 accumulation), straight from the resident A slab.
        agg = jnp.dot(
            a_res[pl.ds(row0, tm), :], xw_ref[...],
            preferred_element_type=jnp.float32,
        ) + b_ref[0]

        # Hidden layers: folded BatchNorm already in W/b; ReLU; back into H.
        # TODO(synk): training-mode dropout omitted (module eval semantics).
        @pl.when(l < num_layers - 1)
        def _():
            h_ref[pl.ds(row0, tm), :] = jnp.maximum(agg, 0.0).astype(h_ref.dtype)

        # Final layer: masked log-softmax (or raw embeddings), lane-dense tile store.
        @pl.when(l == num_layers - 1)
        def _():
            if return_embeds:
                o_ref[...] = agg.astype(o_ref.dtype)
            else:
                col = lax.broadcasted_iota(jnp.int32, agg.shape, 1)
                logits = jnp.where(col < num_classes, agg, jnp.float32(-1e30))
                m = jnp.max(logits, axis=-1, keepdims=True)
                lse = jnp.log(jnp.sum(jnp.exp(logits - m), axis=-1,
                                      keepdims=True)) + m
                o_ref[...] = (logits - lse).astype(o_ref.dtype)

    return kernel


# ---------------- Kernel B: A_hat streamed from HBM (large graphs) ----------

def _make_streamed_kernel(tm, tk, num_classes, num_layers, return_embeds):
    """Grid (layer, row_tile, k_tile); A tiles are pipelined from HBM."""

    def kernel(x_hbm, a_ref, w_ref, b_ref, o_ref, h_ref, xw_ref, acc_ref, dma_sem):
        l = pl.program_id(0)
        i = pl.program_id(1)
        k = pl.program_id(2)          # reduction tile, innermost
        n_k = pl.num_programs(2)
        k0 = pl.multiple_of(k * tk, tk)
        row0 = pl.multiple_of(i * tm, tm)

        # One-time: DMA padded X from HBM into the resident H scratch.
        @pl.when((l == 0) & (i == 0) & (k == 0))
        def _():
            cp = pltpu.make_async_copy(x_hbm, h_ref, dma_sem.at[0])
            cp.start()
            cp.wait()

        # Per layer, spread XW = H @ W over the k steps of the first row tile;
        # each XW row block stays VMEM-resident for all later row tiles.
        @pl.when(i == 0)
        def _():
            xw_ref[pl.ds(k0, tk), :] = jnp.dot(
                h_ref[pl.ds(k0, tk), :], w_ref[0],
                preferred_element_type=jnp.float32,
            ).astype(xw_ref.dtype)

        @pl.when(k == 0)
        def _():
            acc_ref[...] = jnp.zeros_like(acc_ref)

        # acc += A_hat[i, k] @ XW[k]   (MXU, f32 accumulation).
        acc_ref[...] += jnp.dot(
            a_ref[...], xw_ref[pl.ds(k0, tk), :],
            preferred_element_type=jnp.float32,
        )

        last_k = k == n_k - 1

        @pl.when(last_k & (l < num_layers - 1))
        def _():
            h_new = jnp.maximum(acc_ref[...] + b_ref[0], 0.0)
            h_ref[pl.ds(row0, tm), :] = h_new.astype(h_ref.dtype)

        @pl.when(last_k & (l == num_layers - 1))
        def _():
            logits = acc_ref[...] + b_ref[0]
            if return_embeds:
                o_ref[...] = logits.astype(o_ref.dtype)
            else:
                col = lax.broadcasted_iota(jnp.int32, logits.shape, 1)
                logits = jnp.where(col < num_classes, logits, jnp.float32(-1e30))
                m = jnp.max(logits, axis=-1, keepdims=True)
                lse = jnp.log(jnp.sum(jnp.exp(logits - m), axis=-1,
                                      keepdims=True)) + m
                o_ref[...] = (logits - lse).astype(o_ref.dtype)

    return kernel


# ---------------- Wrapper ----------------

def gcn_forward(x, a_hat, params, return_embeds=False, tm=None, tk=None,
                stream_a=None):
    """Fused GCN forward.

    params: list of layer dicts {'w', 'b'[, 'bn_scale', 'bn_shift']}.
    stream_a: None = auto (A_hat VMEM-resident if it fits), True = force the
              HBM-streamed tile path, False = force residency.
    """
    n, in_dim = x.shape
    num_layers = len(params)
    out_dim = params[-1]["w"].shape[1]

    dims = [in_dim] + [p["w"].shape[1] for p in params]
    # Keep the feature pad minimal (one 128-lane slab for typical GCN widths);
    # over-padding only adds HBM traffic / MXU work.
    d_pad = _round_up(max(dims), LANE)

    # Row-tile default: bigger tiles amortize the per-grid-step overhead and
    # only cost tm * d_pad of accumulator / output-tile VMEM.
    if tm is None:
        tm = 512 if n >= 4096 else (256 if n >= 1024 else 128)
    assert tm % 8 == 0, "tm must be a multiple of 8"
    n_pad = _round_up(n, math.lcm(tm, LANE))

    vmem_cap = _vmem_capacity_bytes()
    budget = int(vmem_cap * 0.8)    # headroom for Mosaic internal scratch

    # VMEM need of the resident path (single-buffered explicit scratch slabs +
    # double-buffered small pipeline blocks).
    resident_fixed = (2 * n_pad * d_pad * 2                   # H + XW (bf16)
                      + 2 * tm * d_pad * 4                    # out tiles (f32) x2
                      + 2 * (d_pad * d_pad * 2 + d_pad * 4))  # W / b blocks x2
    a_bytes = n_pad * n_pad * 2
    if stream_a is None:
        a_resident = resident_fixed + a_bytes <= budget
    else:
        a_resident = not stream_a

    if a_resident:
        grid = (num_layers, n_pad // tm)
        kernel = _make_resident_kernel(tm, out_dim, num_layers, return_embeds)
        in_specs = [
            pl.BlockSpec(memory_space=pl.ANY),                            # X (HBM)
            pl.BlockSpec(memory_space=pl.ANY),                            # A_hat (HBM)
            pl.BlockSpec((1, d_pad, d_pad), lambda l, i: (l, 0, 0)),      # W stack
            pl.BlockSpec((1, 1, d_pad), lambda l, i: (l, 0, 0)),          # b stack
        ]
        out_spec = pl.BlockSpec((tm, d_pad), lambda l, i: (i, 0))
        scratch = [
            pltpu.VMEM((n_pad, d_pad), jnp.bfloat16),   # H (activations)
            pltpu.VMEM((n_pad, d_pad), jnp.bfloat16),   # XW (per layer)
            pltpu.VMEM((n_pad, n_pad), jnp.bfloat16),   # resident A_hat
            pltpu.SemaphoreType.DMA((2,)),
        ]
        dim_sem = ("arbitrary", "arbitrary")
        need = resident_fixed + a_bytes
    else:
        if tk is None:
            # Wide k tiles are nearly free in VMEM (A tile + XW slice only);
            # keep lcm padding waste bounded.
            tk = tm
            for cand in (2048, 1024, 512):
                if cand > tm and (_round_up(n, math.lcm(tm, cand, LANE)) - n
                                  <= max(n // 8, LANE)):
                    tk = cand
                    break
        assert tk % LANE == 0, "tk must be a multiple of 128"
        n_pad = _round_up(n, math.lcm(tm, tk, LANE))
        grid = (num_layers, n_pad // tm, n_pad // tk)
        kernel = _make_streamed_kernel(tm, tk, out_dim, num_layers, return_embeds)
        if hasattr(pl, "Buffered"):   # 3-deep A pipeline hides DMA jitter
            a_spec = pl.BlockSpec((tm, tk), lambda l, i, k: (i, k),
                                  pipeline_mode=pl.Buffered(3))
            a_bufs = 3
        else:
            a_spec = pl.BlockSpec((tm, tk), lambda l, i, k: (i, k))
            a_bufs = 2
        in_specs = [
            pl.BlockSpec(memory_space=pl.ANY),                            # X (HBM)
            a_spec,                                                       # A_hat tiles
            pl.BlockSpec((1, d_pad, d_pad), lambda l, i, k: (l, 0, 0)),   # W stack
            pl.BlockSpec((1, 1, d_pad), lambda l, i, k: (l, 0, 0)),       # b stack
        ]
        out_spec = pl.BlockSpec((tm, d_pad), lambda l, i, k: (i, 0))
        scratch = [
            pltpu.VMEM((n_pad, d_pad), jnp.bfloat16),   # H
            pltpu.VMEM((n_pad, d_pad), jnp.bfloat16),   # XW
            pltpu.VMEM((tm, d_pad), jnp.float32),       # accumulator
            pltpu.SemaphoreType.DMA((1,)),
        ]
        dim_sem = ("arbitrary", "arbitrary", "arbitrary")
        need = (2 * n_pad * d_pad * 2 + 3 * tm * d_pad * 4
                + 2 * (d_pad * d_pad * 2 + d_pad * 4) + a_bufs * tm * tk * 2)

    vmem_limit = min(int(vmem_cap * 0.9), max(need + (4 << 20), 32 << 20))

    # Fold BatchNorm1d (running stats) into conv weight/bias, zero-pad and
    # stack all layers: W [L, d_pad, d_pad] (bf16), b [L, 1, d_pad] (f32).
    w_stack = jnp.zeros((num_layers, d_pad, d_pad), jnp.float32)
    b_stack = jnp.zeros((num_layers, 1, d_pad), jnp.float32)
    for li, p in enumerate(params):
        w = p["w"].astype(jnp.float32)
        b = p["b"].reshape(1, -1).astype(jnp.float32)
        if li < num_layers - 1:
            scale = p["bn_scale"].reshape(1, -1).astype(jnp.float32)
            shift = p["bn_shift"].reshape(1, -1).astype(jnp.float32)
            w = w * scale
            b = b * scale + shift
        di, do = w.shape
        w_stack = w_stack.at[li, :di, :do].set(w)
        b_stack = b_stack.at[li, :, :do].set(b)
    w_stack = w_stack.astype(jnp.bfloat16)

    # Zero-padded bf16 inputs (padded A rows/cols are zero -> padded nodes
    # never contribute to valid output rows).
    x_p = jnp.zeros((n_pad, d_pad), jnp.bfloat16).at[:n, :in_dim].set(
        x.astype(jnp.bfloat16))
    a_p = jnp.zeros((n_pad, n_pad), jnp.bfloat16).at[:n, :n].set(
        a_hat.astype(jnp.bfloat16))

    out = pl.pallas_call(
        kernel,
        out_shape=jax.ShapeDtypeStruct((n_pad, d_pad), jnp.float32),
        grid_spec=pltpu.PrefetchScalarGridSpec(
            num_scalar_prefetch=0,
            grid=grid,
            in_specs=in_specs,
            out_specs=out_spec,
            scratch_shapes=scratch,
        ),
        compiler_params=pltpu.CompilerParams(
            dimension_semantics=dim_sem,
            vmem_limit_bytes=vmem_limit,
        ),
    )(x_p, a_p, w_stack, b_stack)

    return out[:n, :out_dim]


# ---------------- Pure-JAX f32 reference (original module semantics) --------

def gcn_reference(x, a_hat, params, return_embeds=False):
    h = x
    num_layers = len(params)
    for li, p in enumerate(params):
        h = a_hat @ (h @ p["w"]) + p["b"]            # GCNConv
        if li < num_layers - 1:
            h = h * p["bn_scale"] + p["bn_shift"]    # BatchNorm1d (eval)
            h = jnp.maximum(h, 0.0)                  # ReLU (dropout: eval no-op)
    if return_embeds:
        return h
    return jax.nn.log_softmax(h, axis=-1)


# ---------------- Deterministic parameter / input construction --------------

def make_params(key, input_dim, hidden_dim, output_dim, num_layers):
    dims = [input_dim] + [hidden_dim] * (num_layers - 1) + [output_dim]
    params = []
    eps = 1e-5
    for i in range(num_layers):
        din, dout = dims[i], dims[i + 1]
        key, wk, gk, bk, mk, vk = jax.random.split(key, 6)
        limit = (6.0 / (din + dout)) ** 0.5
        w = jax.random.uniform(wk, (din, dout), jnp.float32, -limit, limit)
        b = jnp.zeros((1, dout), jnp.float32)
        p = {"w": w, "b": b}
        if i < num_layers - 1:
            # Non-trivial running stats so the BN fold is actually exercised.
            gamma = jax.random.uniform(gk, (dout,), jnp.float32, 0.5, 1.5)
            beta = 0.1 * jax.random.normal(bk, (dout,), jnp.float32)
            r_mean = 0.1 * jax.random.normal(mk, (dout,), jnp.float32)
            r_var = jax.random.uniform(vk, (dout,), jnp.float32, 0.5, 1.5)
            scale = gamma / jnp.sqrt(r_var + eps)
            shift = beta - r_mean * scale
            p["bn_scale"] = scale.reshape(1, dout)
            p["bn_shift"] = shift.reshape(1, dout)
        params.append(p)
    return params


def make_normalized_adj(key, n):
    # Random undirected graph, then D^-1/2 (A + I) D^-1/2 (GCNConv normalization).
    a = (jax.random.uniform(key, (n, n)) < 0.15).astype(jnp.float32)
    a = jnp.maximum(a, a.T)
    a = a * (1.0 - jnp.eye(n)) + jnp.eye(n)
    deg = jnp.sum(a, axis=1)
    d_inv_sqrt = 1.0 / jnp.sqrt(deg)
    return a * d_inv_sqrt[:, None] * d_inv_sqrt[None, :]


if __name__ == "__main__":
    key = jax.random.PRNGKey(0)
    k_x, k_adj, k_p = jax.random.split(key, 3)

    N = 200            # padded to 256 inside the wrapper
    input_dim = 16
    hidden_dim = 32
    output_dim = 8
    num_layers = 3

    x = jax.random.normal(k_x, (N, input_dim), jnp.float32)
    a_hat = make_normalized_adj(k_adj, N)
    params = make_params(k_p, input_dim, hidden_dim, output_dim, num_layers)

    ref = gcn_reference(x, a_hat, params, return_embeds=False)

    # Path 1: VMEM-resident A_hat (auto-selected for small / medium graphs).
    out = jax.block_until_ready(gcn_forward(x, a_hat, params))
    assert out.shape == (N, output_dim)
    assert bool(jnp.isfinite(out).all())
    err = float(jnp.max(jnp.abs(out - ref)))
    assert err < 5e-2, f"resident-A path: max abs err {err}"

    # Path 2: HBM-streamed A_hat tiles (the large-graph fallback).
    out2 = jax.block_until_ready(gcn_forward(x, a_hat, params, stream_a=True))
    assert out2.shape == (N, output_dim)
    assert bool(jnp.isfinite(out2).all())
    err2 = float(jnp.max(jnp.abs(out2 - ref)))
    assert err2 < 5e-2, f"streamed-A path: max abs err {err2}"

    print("KERNEL_OK")
</pallas_src>

<mosaic_0001>
module attributes {stable_mosaic.version = 11 : i64} {
  func.func @kernel(%arg0: i32, %arg1: i32, %arg2: memref<256x128xbf16, #tpu.memory_space<any>>, %arg3: memref<256x256xbf16, #tpu.memory_space<any>>, %arg4: memref<1x128x128xbf16, #tpu.memory_space<vmem>>, %arg5: memref<1x1x128xf32, #tpu.memory_space<vmem>>, %arg6: memref<128x128xf32, #tpu.memory_space<vmem>>, %arg7: memref<256x128xbf16, #tpu.memory_space<vmem>>, %arg8: memref<256x128xbf16, #tpu.memory_space<vmem>>, %arg9: memref<256x256xbf16, #tpu.memory_space<vmem>>, %arg10: memref<2x!tpu.dma_semaphore, #tpu.memory_space<semaphore_mem>>) attributes {dimension_semantics = [#tpu.dimension_semantics<arbitrary>, #tpu.dimension_semantics<arbitrary>], iteration_bounds = array<i64: 3, 2>, scalar_prefetch = 0 : i64, scratch_operands = 4 : i64, tpu.core_type = #tpu.core_type<tc>, window_params = [{}, {}, {transform_indices = @transform_2, window_bounds = array<i64: 1, 128, 128>}, {transform_indices = @transform_3, window_bounds = array<i64: 1, 1, 128>}, {transform_indices = @transform_4, window_bounds = array<i64: 128, 128>}]} {
    %c128_i32 = arith.constant 128 : i32
    %0 = arith.muli %arg1, %c128_i32 : i32
    %1 = tpu.assume_multiple %0, 128 : i32
    %c0_i32 = arith.constant 0 : i32
    %2 = arith.cmpi eq, %arg0, %c0_i32 : i32
    %c0_i32_0 = arith.constant 0 : i32
    %3 = arith.cmpi eq, %arg1, %c0_i32_0 : i32
    %4 = arith.andi %2, %3 : i1
    %5 = arith.extui %4 : i1 to i32
    %c0_i32_1 = arith.constant 0 : i32
    %6 = arith.cmpi ne, %5, %c0_i32_1 : i32
    scf.if %6 {
      %c0_i32_12 = arith.constant 0 : i32
      %24 = tpu.memref_slice %arg10[%c0_i32_12] : memref<2x!tpu.dma_semaphore, #tpu.memory_space<semaphore_mem>> -> memref<1x!tpu.dma_semaphore, #tpu.memory_space<semaphore_mem>>
      %25 = tpu.memref_squeeze %24 : memref<1x!tpu.dma_semaphore, #tpu.memory_space<semaphore_mem>> -> memref<!tpu.dma_semaphore, #tpu.memory_space<semaphore_mem>>
      tpu.enqueue_dma source(%arg2 : memref<256x128xbf16, #tpu.memory_space<any>>) target(%arg7 : memref<256x128xbf16, #tpu.memory_space<vmem>>) target_semaphore(%25 : memref<!tpu.dma_semaphore, #tpu.memory_space<semaphore_mem>>)
      %c1_i32 = arith.constant 1 : i32
      %26 = tpu.memref_slice %arg10[%c1_i32] : memref<2x!tpu.dma_semaphore, #tpu.memory_space<semaphore_mem>> -> memref<1x!tpu.dma_semaphore, #tpu.memory_space<semaphore_mem>>
      %27 = tpu.memref_squeeze %26 : memref<1x!tpu.dma_semaphore, #tpu.memory_space<semaphore_mem>> -> memref<!tpu.dma_semaphore, #tpu.memory_space<semaphore_mem>>
      tpu.enqueue_dma source(%arg3 : memref<256x256xbf16, #tpu.memory_space<any>>) target(%arg9 : memref<256x256xbf16, #tpu.memory_space<vmem>>) target_semaphore(%27 : memref<!tpu.dma_semaphore, #tpu.memory_space<semaphore_mem>>)
      %c0_i32_13 = arith.constant 0 : i32
      %28 = tpu.memref_slice %arg10[%c0_i32_13] : memref<2x!tpu.dma_semaphore, #tpu.memory_space<semaphore_mem>> -> memref<1x!tpu.dma_semaphore, #tpu.memory_space<semaphore_mem>>
      %29 = tpu.memref_squeeze %28 : memref<1x!tpu.dma_semaphore, #tpu.memory_space<semaphore_mem>> -> memref<!tpu.dma_semaphore, #tpu.memory_space<semaphore_mem>>
      tpu.wait_dma2 semaphore(%29 : memref<!tpu.dma_semaphore, #tpu.memory_space<semaphore_mem>>) src(%arg2 : memref<256x128xbf16, #tpu.memory_space<any>>) dst(%arg7 : memref<256x128xbf16, #tpu.memory_space<vmem>>)
      %c1_i32_14 = arith.constant 1 : i32
      %30 = tpu.memref_slice %arg10[%c1_i32_14] : memref<2x!tpu.dma_semaphore, #tpu.memory_space<semaphore_mem>> -> memref<1x!tpu.dma_semaphore, #tpu.memory_space<semaphore_mem>>
      %31 = tpu.memref_squeeze %30 : memref<1x!tpu.dma_semaphore, #tpu.memory_space<semaphore_mem>> -> memref<!tpu.dma_semaphore, #tpu.memory_space<semaphore_mem>>
      tpu.wait_dma2 semaphore(%31 : memref<!tpu.dma_semaphore, #tpu.memory_space<semaphore_mem>>) src(%arg3 : memref<256x256xbf16, #tpu.memory_space<any>>) dst(%arg9 : memref<256x256xbf16, #tpu.memory_space<vmem>>)
    } else {
    }
    %c0_i32_2 = arith.constant 0 : i32
    %7 = arith.cmpi eq, %arg1, %c0_i32_2 : i32
    %8 = arith.extui %7 : i1 to i32
    %c0_i32_3 = arith.constant 0 : i32
    %9 = arith.cmpi ne, %8, %c0_i32_3 : i32
    scf.if %9 {
      %c0_12 = arith.constant 0 : index
      %c0_13 = arith.constant 0 : index
      %24 = vector.load %arg7[%c0_12, %c0_13] : memref<256x128xbf16, #tpu.memory_space<vmem>>, vector<256x128xbf16>
      %c0_14 = arith.constant 0 : index
      %c0_15 = arith.constant 0 : index
      %c0_16 = arith.constant 0 : index
      %25 = vector.load %arg4[%c0_14, %c0_15, %c0_16] : memref<1x128x128xbf16, #tpu.memory_space<vmem>>, vector<1x128x128xbf16>
      %26 = vector.shape_cast %25 : vector<1x128x128xbf16> to vector<128x128xbf16>
      %cst_17 = arith.constant dense<0.000000e+00> : vector<256x128xf32>
      %27 = tpu.matmul %24, %26, %cst_17 {dimension_numbers = #tpu.dot_dimension_numbers<[1], [0], [0], [1], [0, 0, 1, 1], [], []>} : vector<256x128xbf16>, vector<128x128xbf16>, vector<256x128xf32> -> vector<256x128xf32>
      %28 = arith.truncf %27 : vector<256x128xf32> to vector<256x128xbf16>
      %c0_18 = arith.constant 0 : index
      %c0_19 = arith.constant 0 : index
      %29 = vector.load %arg8[%c0_18, %c0_19] : memref<256x128xbf16, #tpu.memory_space<vmem>>, vector<256x128xbf16>
      tpu.vector_store %arg8[%c0_18, %c0_19], %28 {strides = array<i32>} : memref<256x128xbf16, #tpu.memory_space<vmem>>, vector<256x128xbf16>,
    } else {
    }
    %10 = arith.index_cast %1 : i32 to index
    %c0 = arith.constant 0 : index
    %11 = vector.load %arg9[%10, %c0] : memref<256x256xbf16, #tpu.memory_space<vmem>>, vector<128x256xbf16>
    %c0_4 = arith.constant 0 : index
    %c0_5 = arith.constant 0 : index
    %12 = vector.load %arg8[%c0_4, %c0_5] : memref<256x128xbf16, #tpu.memory_space<vmem>>, vector<256x128xbf16>
    %cst = arith.constant dense<0.000000e+00> : vector<128x128xf32>
    %13 = tpu.matmul %11, %12, %cst {dimension_numbers = #tpu.dot_dimension_numbers<[1], [0], [0], [1], [0, 0, 1, 1], [], []>} : vector<128x256xbf16>, vector<256x128xbf16>, vector<128x128xf32> -> vector<128x128xf32>
    %c0_6 = arith.constant 0 : index
    %c0_7 = arith.constant 0 : index
    %c0_8 = arith.constant 0 : index
    %14 = vector.load %arg5[%c0_6, %c0_7, %c0_8] : memref<1x1x128xf32, #tpu.memory_space<vmem>>, vector<1x1x128xf32>
    %15 = vector.shape_cast %14 : vector<1x1x128xf32> to vector<1x128xf32>
    %16 = vector.broadcast %15 : vector<1x128xf32> to vector<128x128xf32>
    %17 = arith.addf %13, %16 : vector<128x128xf32>
    %c2_i32 = arith.constant 2 : i32
    %18 = arith.cmpi slt, %arg0, %c2_i32 : i32
    %19 = arith.extui %18 : i1 to i32
    %c0_i32_9 = arith.constant 0 : i32
    %20 = arith.cmpi ne, %19, %c0_i32_9 : i32
    scf.if %20 {
      %cst_12 = arith.constant 0.000000e+00 : f32
      %24 = vector.broadcast %cst_12 : f32 to vector<128x128xf32>
      %25 = arith.maximumf %17, %24 : vector<128x128xf32>
      %26 = arith.truncf %25 : vector<128x128xf32> to vector<128x128xbf16>
      %27 = arith.index_cast %1 : i32 to index
      %c0_13 = arith.constant 0 : index
      %28 = vector.load %arg7[%27, %c0_13] : memref<256x128xbf16, #tpu.memory_space<vmem>>, vector<128x128xbf16>
      tpu.vector_store %arg7[%27, %c0_13], %26 {strides = array<i32>} : memref<256x128xbf16, #tpu.memory_space<vmem>>, vector<128x128xbf16>,
    } else {
    }
    %c2_i32_10 = arith.constant 2 : i32
    %21 = arith.cmpi eq, %arg0, %c2_i32_10 : i32
    %22 = arith.extui %21 : i1 to i32
    %c0_i32_11 = arith.constant 0 : i32
    %23 = arith.cmpi ne, %22, %c0_i32_11 : i32
    scf.if %23 {
      %24 = tpu.iota {dimensions = array<i32: 1>} : vector<128x128xi32>
      %c8_i32 = arith.constant 8 : i32
      %25 = vector.broadcast %c8_i32 : i32 to vector<128x128xi32>
      %26 = arith.cmpi slt, %24, %25 : vector<128x128xi32>
      %cst_12 = arith.constant -1.000000e+30 : f32
      %27 = vector.broadcast %cst_12 : f32 to vector<128x128xf32>
      %28 = arith.select %26, %17, %27 : vector<128x128xi1>, vector<128x128xf32>
      %cst_13 = arith.constant dense<0xFF800000> : vector<128xf32>
      %29 = vector.multi_reduction <maximumf>, %28, %cst_13 [1] : vector<128x128xf32> to vector<128xf32>
      %30 = vector.shape_cast %29 : vector<128xf32> to vector<128x1xf32>
      %31 = vector.broadcast %30 : vector<128x1xf32> to vector<128x128xf32>
      %32 = arith.subf %28, %31 : vector<128x128xf32>
      %33 = math.exp %32 : vector<128x128xf32>
      %cst_14 = arith.constant dense<0.000000e+00> : vector<128xf32>
      %34 = vector.multi_reduction <add>, %33, %cst_14 [1] : vector<128x128xf32> to vector<128xf32>
      %35 = vector.shape_cast %34 : vector<128xf32> to vector<128x1xf32>
      %36 = math.log %35 : vector<128x1xf32>
      %37 = arith.addf %36, %30 : vector<128x1xf32>
      %38 = vector.broadcast %37 : vector<128x1xf32> to vector<128x128xf32>
      %39 = arith.subf %28, %38 : vector<128x128xf32>
      %c0_15 = arith.constant 0 : index
      %c0_16 = arith.constant 0 : index
      %40 = vector.load %arg6[%c0_15, %c0_16] : memref<128x128xf32, #tpu.memory_space<vmem>>, vector<128x128xf32>
      tpu.vector_store %arg6[%c0_15, %c0_16], %39 {strides = array<i32>} : memref<128x128xf32, #tpu.memory_space<vmem>>, vector<128x128xf32>,
    } else {
    }
    return
  }
  func.func @transform_2(%arg0: i32, %arg1: i32) -> (i32, i32, i32) {
    %c0_i32 = arith.constant 0 : i32
    %c0_i32_0 = arith.constant 0 : i32
    %c0_i32_1 = arith.constant 0 : i32
    return %arg0, %c0_i32, %c0_i32_0 : i32, i32, i32
  }
  func.func @transform_3(%arg0: i32, %arg1: i32) -> (i32, i32, i32) {
    %c0_i32 = arith.constant 0 : i32
    %c0_i32_0 = arith.constant 0 : i32
    %c0_i32_1 = arith.constant 0 : i32
    return %arg0, %c0_i32, %c0_i32_0 : i32, i32, i32
  }
  func.func @transform_4(%arg0: i32, %arg1: i32) -> (i32, i32) {
    %c0_i32 = arith.constant 0 : i32
    %c0_i32_0 = arith.constant 0 : i32
    return %arg1, %c0_i32 : i32, i32
  }
}

</mosaic_0001>

<bundles_post_ra>
// kernel: tpu_custom_call.1
= control target key start
LH: loop header
LB: loop body
LE: loop exit
PB: predicated region body
PF: predicated region fallthrough
CT: control target
= control target key end

     0   :  { %s2802_s0 = inlined_call_operand.hbm [shape: bf16[256,128], index: 0, kind: input, shape index: {}]   ;;  %s2803_s1 = inlined_call_operand.hbm [shape: bf16[256,256], index: 1, kind: input, shape index: {}]   ;;  %s2804_s2 = inlined_call_operand.hbm [shape: bf16[3,128,128], index: 2, kind: input, shape index: {}]   ;;  %s2805_s3 = inlined_call_operand.hbm [shape: f32[3,1,128], index: 3, kind: input, shape index: {}]   ;;  %s2806_s4 = inlined_call_operand.hbm [shape: f32[256,128], index: 4, kind: output, shape index: {}]  }
   0x1   :  { %2811 = sst [smem:[#allocation28_spill]] %s2804_s2 }
   0x2   :  { %9 = vsyncpa [#allocation7], 0 }
   0x3   :  { %11 = vsyncpa [#allocation7 + $0x1], 0 }
   0x4   :  { %12 = vsyncpa [#allocation10], 0 }
   0x5   :  { %14 = vsyncpa [#allocation10 + $0x1], 0 }
   0x6   :  { %15 = vsyncpa [#allocation8], 0 }
   0x7   :  { %17 = vsyncpa [#allocation8 + $0x1], 0  ;;  %s2298_s15 = smov 0   ;;  %s2300_s16 = smov 0  }
   0x8   :  { %s2302_s17 = smov 0   ;;  %s2304_s18 = smov 0  }
   0x9   :  { %s2306_s19 = smov 0   ;;  %s2308_s20 = smov 0  }
   0xa   :  { %s2310_s21 = smov 0   ;;  %s2312_s22 = smov 0  }
   0xb   :  { %s2314_s23 = smov 0   ;;  %s2316_s24 = smov 0  }
   0xc   :  { %s2318_s25 = smov 0  }
   0xd LB: > { %2812 = sst [smem:[#allocation23_spill]] %s2245_s20  ;;  %s1339_s26 = sadd.s32 4294967295, %s2265_s25   ;;  %s2265_s25 = sphi %s2318_s25, %s23_s25   ;;  %s2261_s24 = sphi %s2316_s24, %s2835_s24   ;;  %s2257_s23 = sphi %s2314_s23, %s2827_s23   ;;  %s2253_s22 = sphi %s2312_s22, %s2834_s22   ;;  %s2249_s21 = sphi %s2310_s21, %s2826_s21   ;;  %s2245_s20 = sphi %s2308_s20, %s2825_s20   ;;  %s2241_s19 = sphi %s2306_s19, %s2833_s19   ;;  %s2237_s18 = sphi %s2304_s18, %s2832_s18   ;;  %s2233_s17 = sphi %s2302_s17, %s2831_s17   ;;  %s2229_s16 = sphi %s2300_s16, %s2830_s16   ;;  %s2225_s15 = sphi %s2298_s15, %s2829_s15  }
   0xe   : > { %2813 = sst [smem:[#allocation24_spill]] %s2257_s23  ;;  %s1340_s27 = sadd.s32 4294967294, %s2265_s25  }
   0xf   : > { %s32_s28 = sadd.s32 1, %s2257_s23  ;;  %s35_s29 = sadd.s32 1, %s2261_s24 }
  0x10   : > { %p33_p0 = scmp.ge.s32.totalorder %s32_s28, 2  ;;  %s42_s30 = sadd.s32 1, %s2245_s20 }
  0x11   : > { %p49_p1 = scmp.ne.s32.totalorder %s2245_s20, %s2241_s19  ;;  %p50_p2 = scmp.eq.s32.totalorder %s2265_s25, 0 }
  0x12   : > { %s2837_s28 = smov (%p33_p0, %s32_s28), 0  ;;  %s2839_s29 = smov (!%p33_p0, %s35_s29), %s2261_s24 }
  0x13   : > { %2814 = sst [smem:[#allocation25_spill]] %s2837_s28  ;;  %p2362_p3 = por %p50_p2, %p49_p1 }
  0x14   : > { %p55_p4 = scmp.ne.s32.totalorder %s2241_s19, %s2237_s18  ;;  %p37_p5 = scmp.ge.s32.totalorder %s2839_s29, 3 }
  0x15   : > { %p56_p6 = scmp.eq.s32.totalorder %s1339_s26, 0  ;;  %s91_s6 = ssub.s32 %s2257_s23, %s2837_s28 }
  0x16   : > { %s94_s7 = sadd.s32 1, %s2233_s17  ;;  %s2841_s29 = smov (%p37_p5, %s2839_s29), 0 }
  0x17   : > { %2816 = sst [smem:[#allocation26_spill]] %s2841_s29  ;;  %p2372_p7 = por %p56_p6, %p55_p4 }
  0x18   : > { %p92_p8 = scmp.eq.s32.totalorder %s91_s6, 0  ;;  %s39_s9 = ssub.s32 %s2261_s24, %s2841_s29 }
  0x19   : > { %p104_p9 = scmp.ne.s32.totalorder %s2233_s17, %s2229_s16  ;;  %p40_p10 = scmp.eq.s32.totalorder %s39_s9, 0 }
  0x1a   : > { %p105_p11 = scmp.eq.s32.totalorder %s1339_s26, 5  ;;  %p110_p13 = scmp.ne.s32.totalorder %s2229_s16, %s2225_s15 }
  0x1b   : > { %s2381_s10 = scalar_select %p92_p8, %s2233_s17, %s94_s7  }
  0x1c   : > { %s2384_s11 = scalar_select %p40_p10, %s2245_s20, %s42_s30  }
  0x1d   : > { %p2386_p12 = por %p105_p11, %p104_p9  ;;  %p111_p0 = scmp.eq.s32.totalorder %s1340_s27, 5 }
  0x1e   : > { %2818 = sst [smem:[#allocation27_spill]] %s2384_s11  ;;  %p1850_p1 = scmp.lt.s32.totalorder %s2265_s25, 6 }
  0x1f   : > { %s131_s13 = sand.u32 1, %s2245_s20   ;;  %p2394_p2 = por %p111_p0, %p110_p13 }
  0x20   : > { %s1343_s18 = sshll.u32 %s131_s13, 6  ;;  %s1587_s26 = sshll.u32 %s2261_s24, 6 }
  0x21   : > { %s2821_s2 = sld [smem:[#allocation28_spill]]  ;;  %s135_s29 = scalar_lea.vmem [#allocation6], %s1343_s18 }
  0x22   : > { %s143_s28 = sshll.u32 %s135_s29, 4  ;;  %p2404_p4 = pnand %p1850_p1, %p2362_p3  ;;  %s144_s28 = int_to_ptr.vmem [resolvable:$true] %s143_s28 }
  0x23   : > { %p1346_p5 = scmp.ge.s32.totalorder %s2265_s25, 1  ;;  %p168_p6 = scmp.lt.s32.totalorder %s2265_s25, 7 }
  0x24   : > { %s132_s23 = scalar_lea.sflag [#allocation7], %s131_s13  ;;  %s2267_s11 = smov 64  }
  0x25   : > { %s2268_s20 = smov 4   ;;  %p169_p8 = pnand %p1346_p5, %p168_p6 }
  0x26   : > { %s159_s29 = scalar_lea.hbm %s2805_s3, %s2261_s24  ;;  %s156_s5 = scalar_lea.vmem [#allocation9], %s131_s13 }
  0x27   : > { %s140_s7 = scalar_lea.hbm %s2821_s2, %s1587_s26  ;;  %s161_s6 = sshll.u32 %s159_s29, 4  ;;  %s162_s6 = int_to_ptr.hbm [resolvable:$true] %s161_s6 }
  0x28   : > { %s141_s9 = sshll.u32 %s140_s7, 4  ;;  %s163_s30 = sshll.u32 %s156_s5, 4  ;;  %s142_s9 = int_to_ptr.hbm [resolvable:$true] %s141_s9  ;;  %s164_s30 = int_to_ptr.vmem [resolvable:$true] %s163_s30 }
  0x29   : > { %1842 = dma.hbm_to_vmem [thread:$0]  (!%p2404_p4), %s142_s9, 1024, %s144_s28, %s132_s23, %s2267_s11, %s2267_s11, %s2268_s20  }
  0x2a   : > { %s154_s7 = scalar_lea.sflag [#allocation10], %s131_s13  ;;  %172 = sbr.rel (%p169_p8) target bundleno = 861 (0x35d), region = 28 }
  0x2b   : > { %1845 = dma.hbm_to_vmem [thread:$0]  (!%p2404_p4), %s162_s6, 16, %s164_s30, %s154_s7  }
  0x2c   : > { %s2419_s2 = sand.u32 (!%p169_p8), 1, %s2241_s19  }
  0x2d   : > { %s1347_s20 = sshll.u32 (!%p169_p8), %s2419_s2, 6  ;;  %s175_s23 = scalar_lea.sflag (!%p169_p8), [#allocation7], %s2419_s2 }
  0x2e   : > { %s2423_s28 = scalar_lea.vmem (!%p169_p8), [#allocation6], %s1347_s20 }
  0x2f   : > { %2204 = dma.done.wait (%p2372_p7), %s175_s23, 1024  }
  0x30   : > { %2206 = vsyncadd (%p2372_p7), %s175_s23, 4294966272  ;;  %s185_s11 = scalar_lea.sflag [#allocation10], %s2419_s2  ;;  %s187_s13 = scalar_lea.vmem [#allocation9], %s2419_s2 }
  0x31   : > { %2208 = dma.done.wait (%p2372_p7), %s185_s11, 16  }
  0x32   : > { %2210 = vsyncadd (%p2372_p7), %s185_s11, 4294967280  ;;  %s210_s9 = sand.u32 1, %s2229_s16   ;;  %s2437_s27 = sshll.u32 %s2249_s21, 7 }
  0x33   : > { %s1348_s26 = sshll.u32 %s210_s9, 7  ;;  %p215_p3 = scmp.eq.s32.totalorder %s2253_s22, 0 }
  0x34   : > { %p216_p9 = scmp.eq.s32.totalorder %s2249_s21, 0  ;;  %s228_s6 = sshll.u32 %s2802_s0, 4  ;;  %s229_s6 = int_to_ptr.hbm [resolvable:$true] %s228_s6 }
  0x35   : > { %s2269_s8 = smov [#allocation2]   ;;  %s242_s23 = sshll.u32 %s2803_s1, 4  ;;  %s243_s23 = int_to_ptr.hbm [resolvable:$true] %s242_s23 }
  0x36   : > { %p2446_p10 = pnand %p216_p9, %p215_p3  ;;  %s230_s30 = sshll.u32 %s2269_s8, 4  ;;  %s231_s30 = int_to_ptr.vmem [resolvable:$true] %s230_s30 }
  0x37   : > { %s2270_s11 = smov [#allocation4]   ;;  %s2459_s29 = scalar_lea.vmem [#allocation11], %s1348_s26 }
  0x38   : > { %p1832_p7 = pneg %p2446_p10  ;;  %s244_s18 = sshll.u32 %s2270_s11, 4  ;;  %s245_s18 = int_to_ptr.vmem [resolvable:$true] %s244_s18 }
  0x39   : > { %1833 = dma.hbm_to_vmem [thread:$0]  (!%p2446_p10), %s229_s6, 2048, %s231_s30, [#allocation5] }
  0x3a   : > { %1834 = dma.hbm_to_vmem [thread:$0]  (!%p2446_p10), %s243_s23, 4096, %s245_s18, [#allocation5 + $0x1] }
  0x3b   : > { %2212 = dma.done.wait (%p1832_p7), [#allocation5], 2048 }
  0x3c   : > { %2214 = vsyncadd (%p1832_p7), [#allocation5], 4294965248 }
  0x3d   : > { %2216 = dma.done.wait (%p1832_p7), [#allocation5 + $0x1], 4096 }
  0x3e   : > { %2218 = vsyncadd (%p1832_p7), [#allocation5 + $0x1], 4294963200  ;;  %p1350_p11 = scmp.ne.s32.totalorder %s2249_s21, 0 }
  0x40   : > { %257 = sbr.rel (%p1350_p11) target bundleno = 294 (0x126), region = 52 }
  0x45   : > { %v1611_v0 = vld [vmem:[%s2423_s28 + $0x38] sm:$0xff]  ;;  %v1610_v1 = vld [vmem:[%s2423_s28 + $0x30] sm:$0xff]  ;;  %v1609_v2 = vld [vmem:[%s2423_s28 + $0x28] sm:$0xff] }
  0x46   : > { %450 = vmatpush.bf16.msra.mxu0 %v1611_v0  ;;  %1788 = vmatpush.bf16.msra.mxu1 %v1611_v0  ;;  %v1608_v3 = vld [vmem:[%s2423_s28 + $0x20] sm:$0xff]  ;;  %v1607_v4 = vld [vmem:[%s2423_s28 + $0x18] sm:$0xff]  ;;  %v1606_v5 = vld [vmem:[%s2423_s28 + $0x10] sm:$0xff] }
  0x47   : > { %1789 = vmatpush.bf16.msra.mxu2 %v1611_v0  ;;  %1790 = vmatpush.bf16.msra.mxu3 %v1611_v0  ;;  %v1605_v6 = vld [vmem:[%s2423_s28 + $0x8] sm:$0xff]  ;;  %v1604_v7 = vld [vmem:[%s2423_s28] sm:$0xff]  ;;  %v1590_v16 = vld [vmem:[#allocation2 + $0x10] sm:$0xff] }
  0x48   : > { %v1588_v8 = vld [vmem:[#allocation2] sm:$0xff]  ;;  %v1589_v12 = vld [vmem:[#allocation2 + $0x8] sm:$0xff]  ;;  %v1594_v17 = vld [vmem:[#allocation2 + $0x30] sm:$0xff] }
  0x49   : > { %v1592_v9 = vld [vmem:[#allocation2 + $0x20] sm:$0xff]  ;;  %v1593_v13 = vld [vmem:[#allocation2 + $0x28] sm:$0xff]  ;;  %v1598_v18 = vld [vmem:[#allocation2 + $0x50] sm:$0xff] }
  0x4a   : > { %451 = vmatpush.bf16.msra.mxu0 %v1610_v1  ;;  %1791 = vmatpush.bf16.msra.mxu1 %v1610_v1  ;;  %v1596_v10 = vld [vmem:[#allocation2 + $0x40] sm:$0xff]  ;;  %v1597_v14 = vld [vmem:[#allocation2 + $0x48] sm:$0xff]  ;;  %v1602_v19 = vld [vmem:[#allocation2 + $0x70] sm:$0xff] }
  0x4b   : > { %1792 = vmatpush.bf16.msra.mxu2 %v1610_v1  ;;  %1793 = vmatpush.bf16.msra.mxu3 %v1610_v1  ;;  %v1600_v11 = vld [vmem:[#allocation2 + $0x60] sm:$0xff]  ;;  %v1601_v15 = vld [vmem:[#allocation2 + $0x68] sm:$0xff]  ;;  %v1591_v20 = vld [vmem:[#allocation2 + $0x18] sm:$0xff] }
  0x4c   : > { %v1595_v21 = vld [vmem:[#allocation2 + $0x38] sm:$0xff] }
  0x4d   : > { %v1599_v22 = vld [vmem:[#allocation2 + $0x58] sm:$0xff] }
  0x4e   : > { %452 = vmatpush.bf16.msra.mxu0 %v1609_v2  ;;  %1794 = vmatpush.bf16.msra.mxu1 %v1609_v2  ;;  %v1603_v23 = vld [vmem:[#allocation2 + $0x78] sm:$0xff] }
  0x4f   : > { %1795 = vmatpush.bf16.msra.mxu2 %v1609_v2  ;;  %1796 = vmatpush.bf16.msra.mxu3 %v1609_v2 }
  0x52   : > { %453 = vmatpush.bf16.msra.mxu0 %v1608_v3  ;;  %1797 = vmatpush.bf16.msra.mxu1 %v1608_v3 }
  0x53   : > { %1798 = vmatpush.bf16.msra.mxu2 %v1608_v3  ;;  %1799 = vmatpush.bf16.msra.mxu3 %v1608_v3 }
  0x56   : > { %454 = vmatpush.bf16.msra.mxu0 %v1607_v4  ;;  %1800 = vmatpush.bf16.msra.mxu1 %v1607_v4 }
  0x57   : > { %1801 = vmatpush.bf16.msra.mxu2 %v1607_v4  ;;  %1802 = vmatpush.bf16.msra.mxu3 %v1607_v4 }
  0x5a   : > { %455 = vmatpush.bf16.msra.mxu0 %v1606_v5  ;;  %1803 = vmatpush.bf16.msra.mxu1 %v1606_v5 }
  0x5b   : > { %1804 = vmatpush.bf16.msra.mxu2 %v1606_v5  ;;  %1805 = vmatpush.bf16.msra.mxu3 %v1606_v5 }
  0x5e   : > { %456 = vmatpush.bf16.msra.mxu0 %v1605_v6  ;;  %1806 = vmatpush.bf16.msra.mxu1 %v1605_v6 }
  0x5f   : > { %1807 = vmatpush.bf16.msra.mxu2 %v1605_v6  ;;  %1808 = vmatpush.bf16.msra.mxu3 %v1605_v6 }
  0x62   : > { %457 = vmatpush.bf16.msra.mxu0 %v1604_v7  ;;  %1809 = vmatpush.bf16.msra.mxu1 %v1604_v7 }
  0x63   : > { %1810 = vmatpush.bf16.msra.mxu2 %v1604_v7  ;;  %1811 = vmatpush.bf16.msra.mxu3 %v1604_v7 }
  0x65   : > { %458 = vmatmul.bf16.vlgmr.msra.gmra.mxu0 %v1588_v8  ;;  %478 = vmatmul.bf16.vlgmr.msra.gmra.mxu1 %v1592_v9 }
  0x66   : > { %498 = vmatmul.bf16.vlgmr.msra.gmra.mxu2 %v1596_v10  ;;  %518 = vmatmul.bf16.vlgmr.msra.gmra.mxu3 %v1600_v11 }
  0x75   : > { %463 = vmatmul.bf16.gmra.mxu0 %v1589_v12  ;;  %483 = vmatmul.bf16.gmra.mxu1 %v1593_v13 }
  0x76   : > { %503 = vmatmul.bf16.gmra.mxu2 %v1597_v14  ;;  %523 = vmatmul.bf16.gmra.mxu3 %v1601_v15 }
  0x85   : > { %468 = vmatmul.bf16.gmra.mxu0 %v1590_v16  ;;  %488 = vmatmul.bf16.gmra.mxu1 %v1594_v17 }
  0x86   : > { %508 = vmatmul.bf16.gmra.mxu2 %v1598_v18  ;;  %528 = vmatmul.bf16.gmra.mxu3 %v1602_v19 }
  0x95   : > { %473 = vmatmul.bf16.gmra.mxu0 %v1591_v20  ;;  %493 = vmatmul.bf16.gmra.mxu1 %v1595_v21 }
  0x96   : > { %513 = vmatmul.bf16.gmra.mxu2 %v1599_v22  ;;  %533 = vmatmul.bf16.gmra.mxu3 %v1603_v23 }
  0xe2   : > { %v459_v24 = vpop.f32.mrf.mxu0  ;;  %v479_v25 = vpop.f32.mrf.mxu1 }
  0xe9   : > { %v499_v26 = vpop.f32.mrf.mxu2  ;;  %v519_v27 = vpop.f32.mrf.mxu3 }
  0xea   : > { %v461_v28 = vpop.f32.mrf.mxu0  ;;  %v481_v29 = vpop.f32.mrf.mxu1 }
  0xeb   : > { %v1649_v30 = vpack.c.bf16 %v461_v28, %v459_v24  ;;  %v1669_v31 = vpack.c.bf16 %v481_v29, %v479_v25 }
  0xed   : > { %1650 = vst [vmem:[#allocation3 + $0x30] sm:$0xff] %v1649_v30  }
  0xee   : > { %1769 = vst [vmem:[#allocation3 + $0x50] sm:$0xff] %v1669_v31  }
  0xf1   : > { %v501_v32 = vpop.f32.mrf.mxu2  ;;  %v521_v33 = vpop.f32.mrf.mxu3 }
  0xf2   : > { %v1689_v34 = vpack.c.bf16 %v501_v32, %v499_v26  ;;  %v1709_v35 = vpack.c.bf16 %v521_v33, %v519_v27  ;;  %v464_v36 = vpop.f32.mrf.mxu0  ;;  %v484_v37 = vpop.f32.mrf.mxu1 }
  0xf4   : > { %1773 = vst [vmem:[#allocation3 + $0x40] sm:$0xff] %v1689_v34  }
  0xf5   : > { %1777 = vst [vmem:[#allocation3 + $0x60] sm:$0xff] %v1709_v35  }
  0xf9   : > { %v504_v38 = vpop.f32.mrf.mxu2  ;;  %v524_v39 = vpop.f32.mrf.mxu3 }
  0xfa   : > { %v466_v40 = vpop.f32.mrf.mxu0  ;;  %v486_v41 = vpop.f32.mrf.mxu1 }
  0xfb   : > { %v1654_v42 = vpack.c.bf16 %v466_v40, %v464_v36  ;;  %v1674_v43 = vpack.c.bf16 %v486_v41, %v484_v37 }
  0xfd   : > { %1766 = vst [vmem:[#allocation3] sm:$0xff] %v1654_v42  }
  0xfe   : > { %1770 = vst [vmem:[#allocation3 + $0x68] sm:$0xff] %v1674_v43  }
 0x101   : > { %v506_v44 = vpop.f32.mrf.mxu2  ;;  %v526_v45 = vpop.f32.mrf.mxu3 }
 0x102   : > { %v1694_v46 = vpack.c.bf16 %v506_v44, %v504_v38  ;;  %v1714_v47 = vpack.c.bf16 %v526_v45, %v524_v39  ;;  %v469_v48 = vpop.f32.mrf.mxu0  ;;  %v489_v49 = vpop.f32.mrf.mxu1 }
 0x104   : > { %1774 = vst [vmem:[#allocation3 + $0x20] sm:$0xff] %v1694_v46  }
 0x105   : > { %1778 = vst [vmem:[#allocation3 + $0x70] sm:$0xff] %v1714_v47  }
 0x109   : > { %v509_v50 = vpop.f32.mrf.mxu2  ;;  %v529_v51 = vpop.f32.mrf.mxu3 }
 0x10a   : > { %v471_v52 = vpop.f32.mrf.mxu0  ;;  %v491_v53 = vpop.f32.mrf.mxu1 }
 0x10b   : > { %v1659_v54 = vpack.c.bf16 %v471_v52, %v469_v48  ;;  %v1679_v55 = vpack.c.bf16 %v491_v53, %v489_v49 }
 0x10d   : > { %1767 = vst [vmem:[#allocation3 + $0x58] sm:$0xff] %v1659_v54  }
 0x10e   : > { %1771 = vst [vmem:[#allocation3 + $0x8] sm:$0xff] %v1679_v55  }
 0x111   : > { %v511_v56 = vpop.f32.mrf.mxu2  ;;  %v531_v57 = vpop.f32.mrf.mxu3 }
 0x112   : > { %v1699_v58 = vpack.c.bf16 %v511_v56, %v509_v50  ;;  %v1719_v59 = vpack.c.bf16 %v531_v57, %v529_v51  ;;  %v474_v60 = vpop.f32.mrf.mxu0  ;;  %v494_v61 = vpop.f32.mrf.mxu1 }
 0x114   : > { %1775 = vst [vmem:[#allocation3 + $0x10] sm:$0xff] %v1699_v58  }
 0x115   : > { %1779 = vst [vmem:[#allocation3 + $0x78] sm:$0xff] %v1719_v59  }
 0x119   : > { %v514_v62 = vpop.f32.mrf.mxu2  ;;  %v534_v63 = vpop.f32.mrf.mxu3 }
 0x11a   : > { %v476_v0 = vpop.f32.mrf.mxu0  ;;  %v496_v1 = vpop.f32.mrf.mxu1 }
 0x11b   : > { %v1664_v2 = vpack.c.bf16 %v476_v0, %v474_v60  ;;  %v1684_v3 = vpack.c.bf16 %v496_v1, %v494_v61 }
 0x11d   : > { %1768 = vst [vmem:[#allocation3 + $0x18] sm:$0xff] %v1664_v2  }
 0x11e   : > { %1772 = vst [vmem:[#allocation3 + $0x48] sm:$0xff] %v1684_v3  }
 0x121   : > { %v516_v4 = vpop.f32.mrf.mxu2  ;;  %v536_v5 = vpop.f32.mrf.mxu3 }
 0x122   : > { %v1704_v6 = vpack.c.bf16 %v516_v4, %v514_v62  ;;  %v1724_v7 = vpack.c.bf16 %v536_v5, %v534_v63 }
 0x124   : > { %1776 = vst [vmem:[#allocation3 + $0x38] sm:$0xff] %v1704_v6  }
 0x125   : > { %1780 = vst [vmem:[#allocation3 + $0x28] sm:$0xff] %v1724_v7  }
 0x126 PF: > { %s603_s21 = sshra.s32 %s2437_s27, 3  ;;  %v1636_v8 = vld [vmem:[#allocation3 + $0x48] sm:$0xff]  ;;  %v1643_v11 = vld [vmem:[#allocation3 + $0x78] sm:$0xff]  ;;  %v1642_v13 = vld [vmem:[#allocation3 + $0x70] sm:$0xff]  ;;  %s2472_s28 = scalar_lea.vmem [#allocation4], %s2437_s27 }
 0x127   : > { %836 = vmatpush.bf16.msra.mxu0 %v1636_v8  ;;  %1812 = vmatpush.bf16.msra.mxu2 %v1636_v8  ;;  %v1635_v10 = vld [vmem:[#allocation3 + $0x8] sm:$0xff]  ;;  %v1633_v14 = vld [vmem:[#allocation3 + $0x50] sm:$0xff]  ;;  %v1641_v15 = vld [vmem:[#allocation3 + $0x60] sm:$0xff]  ;;  %p1577_p13 = scmp.ge.s32.totalorder %s2253_s22, 2 }
 0x128   : > { %v1634_v12 = vld [vmem:[#allocation3 + $0x68] sm:$0xff]  ;;  %v1632_v16 = vld [vmem:[#allocation3 + $0x18] sm:$0xff]  ;;  %v1639_v19 = vld [vmem:[#allocation3 + $0x10] sm:$0xff]  ;;  %s1578_s2 = sshll.u32 (!%p1577_p13), %s603_s21, 2 }
 0x129   : > { %v1631_v18 = vld [vmem:[#allocation3 + $0x58] sm:$0xff]  ;;  %v1630_v20 = vld [vmem:[#allocation3] sm:$0xff]  ;;  %v1629_v22 = vld [vmem:[#allocation3 + $0x30] sm:$0xff] }
 0x12a   : > { %v1638_v21 = vld [vmem:[#allocation3 + $0x20] sm:$0xff]  ;;  %v1614_v25 = vld [vmem:[%s2472_s28 + $0x4] sm:$0xf0]  ;;  %v1453_v29 = vld [vmem:[%s2472_s28 + $0x8] sm:$0xf0] }
 0x12b   : > { %837 = vmatpush.bf16.msra.mxu0 %v1635_v10  ;;  %1813 = vmatpush.bf16.msra.mxu2 %v1635_v10  ;;  %v1640_v17 = vld [vmem:[#allocation3 + $0x38] sm:$0xff]  ;;  %v1637_v23 = vld [vmem:[#allocation3 + $0x40] sm:$0xff]  ;;  %v1622_v27 = vld [vmem:[%s2472_s28 + $0x44] sm:$0xf0] }
 0x12c   : > { %v1644_v9 = vld [vmem:[#allocation3 + $0x28] sm:$0xff]  ;;  %v1451_v24 = vld [vmem:[%s2472_s28] sm:$0xf]  ;;  %v1613_v28 = vld [vmem:[%s2472_s28 + $0x4] sm:$0xf] }
 0x12d   : > { %885 = vmatpush.bf16.msra.mxu1 %v1644_v9  ;;  %1820 = vmatpush.bf16.msra.mxu3 %v1644_v9  ;;  %v1483_v26 = vld [vmem:[%s2472_s28 + $0x40] sm:$0xf]  ;;  %v1621_v30 = vld [vmem:[%s2472_s28 + $0x44] sm:$0xf]  ;;  %v1485_v31 = vld [vmem:[%s2472_s28 + $0x48] sm:$0xf0]  ;;  %v1452_v32 = vor.u32 %v1614_v25, %v1451_v24  ;;  %v1456_v34 = vor.u32 %v1613_v28, %v1453_v29 }
 0x12e   : > { %v1484_v33 = vor.u32 %v1622_v27, %v1483_v26  ;;  %v1488_v35 = vor.u32 %v1621_v30, %v1485_v31  ;;  %v1459_v36 = vld [vmem:[%s2472_s28 + $0x10] sm:$0xf]  ;;  %v1616_v37 = vld [vmem:[%s2472_s28 + $0x14] sm:$0xf0]  ;;  %v1615_v40 = vld [vmem:[%s2472_s28 + $0x14] sm:$0xf] }
 0x12f   : > { %838 = vmatpush.bf16.msra.mxu0 %v1634_v12  ;;  %1814 = vmatpush.bf16.msra.mxu2 %v1634_v12  ;;  %v1491_v38 = vld [vmem:[%s2472_s28 + $0x50] sm:$0xf]  ;;  %v1624_v39 = vld [vmem:[%s2472_s28 + $0x54] sm:$0xf0]  ;;  %v1461_v41 = vld [vmem:[%s2472_s28 + $0x18] sm:$0xf0]  ;;  %v1460_v44 = vor.u32 %v1616_v37, %v1459_v36 }
 0x130   : > { %v1623_v42 = vld [vmem:[%s2472_s28 + $0x54] sm:$0xf]  ;;  %v1493_v43 = vld [vmem:[%s2472_s28 + $0x58] sm:$0xf0]  ;;  %v1492_v45 = vor.u32 %v1624_v39, %v1491_v38  ;;  %v1464_v46 = vor.u32 %v1615_v40, %v1461_v41  ;;  %v1467_v48 = vld [vmem:[%s2472_s28 + $0x20] sm:$0xf] }
 0x131   : > { %886 = vmatpush.bf16.msra.mxu1 %v1643_v11  ;;  %1821 = vmatpush.bf16.msra.mxu3 %v1643_v11  ;;  %v1496_v47 = vor.u32 %v1623_v42, %v1493_v43  ;;  %v1618_v49 = vld [vmem:[%s2472_s28 + $0x24] sm:$0xf0]  ;;  %v1499_v50 = vld [vmem:[%s2472_s28 + $0x60] sm:$0xf]  ;;  %v1617_v52 = vld [vmem:[%s2472_s28 + $0x24] sm:$0xf] }
 0x132   : > { %v1626_v51 = vld [vmem:[%s2472_s28 + $0x64] sm:$0xf0]  ;;  %v1469_v53 = vld [vmem:[%s2472_s28 + $0x28] sm:$0xf0]  ;;  %v1625_v54 = vld [vmem:[%s2472_s28 + $0x64] sm:$0xf]  ;;  %v1468_v56 = vor.u32 %v1618_v49, %v1467_v48 }
 0x133   : > { %839 = vmatpush.bf16.msra.mxu0 %v1633_v14  ;;  %1815 = vmatpush.bf16.msra.mxu2 %v1633_v14  ;;  %v1501_v55 = vld [vmem:[%s2472_s28 + $0x68] sm:$0xf0]  ;;  %v1500_v57 = vor.u32 %v1626_v51, %v1499_v50  ;;  %v1472_v58 = vor.u32 %v1617_v52, %v1469_v53  ;;  %v1475_v60 = vld [vmem:[%s2472_s28 + $0x30] sm:$0xf]  ;;  %v1620_v61 = vld [vmem:[%s2472_s28 + $0x34] sm:$0xf0] }
 0x134   : > { %v1504_v59 = vor.u32 %v1625_v54, %v1501_v55  ;;  %v1507_v62 = vld [vmem:[%s2472_s28 + $0x70] sm:$0xf]  ;;  %v1628_v63 = vld [vmem:[%s2472_s28 + $0x74] sm:$0xf0]  ;;  %v1619_v0 = vld [vmem:[%s2472_s28 + $0x34] sm:$0xf]  ;;  %v1476_v4 = vor.u32 %v1620_v61, %v1475_v60 }
 0x135   : > { %887 = vmatpush.bf16.msra.mxu1 %v1642_v13  ;;  %1822 = vmatpush.bf16.msra.mxu3 %v1642_v13  ;;  %v1477_v1 = vld [vmem:[%s2472_s28 + $0x38] sm:$0xf0]  ;;  %v1627_v2 = vld [vmem:[%s2472_s28 + $0x74] sm:$0xf]  ;;  %v1508_v5 = vor.u32 %v1628_v63, %v1507_v62  ;;  %v1946_v8 = vld [vmem:[%s187_s13] ss:$0 sm:$0xff] }
 0x136   : > { %v1509_v3 = vld [vmem:[%s2472_s28 + $0x78] sm:$0xf0]  ;;  %v1480_v6 = vor.u32 %v1619_v0, %v1477_v1  ;;  %s971_s13 = scalar_lea.vmem (!%p1577_p13), [#allocation2], %s1578_s2 }
 0x137   : > { %840 = vmatpush.bf16.msra.mxu0 %v1632_v16  ;;  %1816 = vmatpush.bf16.msra.mxu2 %v1632_v16  ;;  %v1512_v7 = vor.u32 %v1627_v2, %v1509_v3 }
 0x139   : > { %888 = vmatpush.bf16.msra.mxu1 %v1641_v15  ;;  %1823 = vmatpush.bf16.msra.mxu3 %v1641_v15 }
 0x13b   : > { %841 = vmatpush.bf16.msra.mxu0 %v1631_v18  ;;  %1817 = vmatpush.bf16.msra.mxu2 %v1631_v18 }
 0x13d   : > { %889 = vmatpush.bf16.msra.mxu1 %v1640_v17  ;;  %1824 = vmatpush.bf16.msra.mxu3 %v1640_v17 }
 0x13f   : > { %842 = vmatpush.bf16.msra.mxu0 %v1630_v20  ;;  %1818 = vmatpush.bf16.msra.mxu2 %v1630_v20 }
 0x141   : > { %890 = vmatpush.bf16.msra.mxu1 %v1639_v19  ;;  %1825 = vmatpush.bf16.msra.mxu3 %v1639_v19 }
 0x143   : > { %843 = vmatpush.bf16.msra.mxu0 %v1629_v22  ;;  %1819 = vmatpush.bf16.msra.mxu2 %v1629_v22 }
 0x145   : > { %891 = vmatpush.bf16.msra.mxu1 %v1638_v21  ;;  %1826 = vmatpush.bf16.msra.mxu3 %v1638_v21 }
 0x146   : > { %844 = vmatmul.bf16.vlgmr.msra.gmra.mxu0 %v1452_v32  ;;  %864 = vmatmul.bf16.vlgmr.msra.gmra.mxu2 %v1484_v33 }
 0x149   : > { %892 = vmatpush.bf16.msra.mxu1 %v1637_v23  ;;  %1827 = vmatpush.bf16.msra.mxu3 %v1637_v23 }
 0x14c   : > { %893 = vmatmul.bf16.vlgmr.msra.gmra.mxu1 %v1456_v34  ;;  %913 = vmatmul.bf16.vlgmr.msra.gmra.mxu3 %v1488_v35 }
 0x156   : > { %849 = vmatmul.bf16.gmra.mxu0 %v1460_v44  ;;  %869 = vmatmul.bf16.gmra.mxu2 %v1492_v45 }
 0x15c   : > { %898 = vmatmul.bf16.gmra.mxu1 %v1464_v46  ;;  %918 = vmatmul.bf16.gmra.mxu3 %v1496_v47 }
 0x166   : > { %854 = vmatmul.bf16.gmra.mxu0 %v1468_v56  ;;  %874 = vmatmul.bf16.gmra.mxu2 %v1500_v57 }
 0x16c   : > { %903 = vmatmul.bf16.gmra.mxu1 %v1472_v58  ;;  %923 = vmatmul.bf16.gmra.mxu3 %v1504_v59 }
 0x176   : > { %859 = vmatmul.bf16.gmra.mxu0 %v1476_v4  ;;  %879 = vmatmul.bf16.gmra.mxu2 %v1508_v5 }
 0x17c   : > { %908 = vmatmul.bf16.gmra.mxu1 %v1480_v6  ;;  %928 = vmatmul.bf16.gmra.mxu3 %v1512_v7 }
 0x1c3   : > { %v845_v9 = vpop.f32.mrf.mxu0 }
 0x1c4   : > { %v846_v10 = vadd.f32 %v1946_v8, %v845_v9 }
 0x1c9   : > { %v894_v11 = vpop.f32.mrf.mxu1  ;;  %v865_v13 = vpop.f32.mrf.mxu2 }
 0x1ca   : > { %v2508_v12 = vadd.f32 %v894_v11, %v846_v10  ;;  %v866_v14 = vadd.f32 %v1946_v8, %v865_v13 }
 0x1cb   : > { %v847_v16 = vpop.f32.mrf.mxu0 }
 0x1cc   : > { %v848_v18 = vadd.f32 %v1946_v8, %v847_v16 }
 0x1cf   : > { %v914_v15 = vpop.f32.mrf.mxu3 }
 0x1d0   : > { %v2510_v17 = vadd.f32 %v914_v15, %v866_v14 }
 0x1d1   : > { %v896_v19 = vpop.f32.mrf.mxu1  ;;  %v867_v21 = vpop.f32.mrf.mxu2 }
 0x1d2   : > { %v2512_v20 = vadd.f32 %v896_v19, %v848_v18  ;;  %v868_v22 = vadd.f32 %v1946_v8, %v867_v21 }
 0x1d3   : > { %v850_v24 = vpop.f32.mrf.mxu0 }
 0x1d4   : > { %v851_v26 = vadd.f32 %v1946_v8, %v850_v24 }
 0x1d7   : > { %v916_v23 = vpop.f32.mrf.mxu3 }
 0x1d8   : > { %v2514_v25 = vadd.f32 %v916_v23, %v868_v22 }
 0x1d9   : > { %v899_v27 = vpop.f32.mrf.mxu1  ;;  %v870_v29 = vpop.f32.mrf.mxu2 }
 0x1da   : > { %v2516_v28 = vadd.f32 %v899_v27, %v851_v26  ;;  %v871_v30 = vadd.f32 %v1946_v8, %v870_v29 }
 0x1db   : > { %v852_v32 = vpop.f32.mrf.mxu0 }
 0x1dc   : > { %v853_v34 = vadd.f32 %v1946_v8, %v852_v32 }
 0x1df   : > { %v919_v31 = vpop.f32.mrf.mxu3 }
 0x1e0   : > { %v2518_v33 = vadd.f32 %v919_v31, %v871_v30 }
 0x1e1   : > { %v901_v35 = vpop.f32.mrf.mxu1  ;;  %v872_v37 = vpop.f32.mrf.mxu2 }
 0x1e2   : > { %v2520_v36 = vadd.f32 %v901_v35, %v853_v34  ;;  %v873_v38 = vadd.f32 %v1946_v8, %v872_v37 }
 0x1e3   : > { %v855_v40 = vpop.f32.mrf.mxu0 }
 0x1e4   : > { %v856_v42 = vadd.f32 %v1946_v8, %v855_v40 }
 0x1e7   : > { %v921_v39 = vpop.f32.mrf.mxu3 }
 0x1e8   : > { %v2522_v41 = vadd.f32 %v921_v39, %v873_v38 }
 0x1e9   : > { %v904_v43 = vpop.f32.mrf.mxu1  ;;  %v875_v45 = vpop.f32.mrf.mxu2 }
 0x1ea   : > { %v2524_v44 = vadd.f32 %v904_v43, %v856_v42  ;;  %v876_v46 = vadd.f32 %v1946_v8, %v875_v45 }
 0x1eb   : > { %v857_v48 = vpop.f32.mrf.mxu0 }
 0x1ec   : > { %v858_v50 = vadd.f32 %v1946_v8, %v857_v48 }
 0x1ef   : > { %v924_v47 = vpop.f32.mrf.mxu3 }
 0x1f0   : > { %v2526_v49 = vadd.f32 %v924_v47, %v876_v46 }
 0x1f1   : > { %v906_v51 = vpop.f32.mrf.mxu1  ;;  %v877_v53 = vpop.f32.mrf.mxu2 }
 0x1f2   : > { %v2528_v52 = vadd.f32 %v906_v51, %v858_v50  ;;  %v878_v54 = vadd.f32 %v1946_v8, %v877_v53 }
 0x1f3   : > { %v860_v56 = vpop.f32.mrf.mxu0 }
 0x1f4   : > { %v861_v58 = vadd.f32 %v1946_v8, %v860_v56 }
 0x1f7   : > { %v926_v55 = vpop.f32.mrf.mxu3 }
 0x1f8   : > { %v2530_v57 = vadd.f32 %v926_v55, %v878_v54 }
 0x1f9   : > { %v909_v59 = vpop.f32.mrf.mxu1  ;;  %v880_v61 = vpop.f32.mrf.mxu2 }
 0x1fa   : > { %v2532_v60 = vadd.f32 %v909_v59, %v861_v58  ;;  %v881_v62 = vadd.f32 %v1946_v8, %v880_v61 }
 0x1fb   : > { %v862_v0 = vpop.f32.mrf.mxu0 }
 0x1fc   : > { %v863_v2 = vadd.f32 %v1946_v8, %v862_v0 }
 0x1ff   : > { %v929_v63 = vpop.f32.mrf.mxu3 }
 0x200   : > { %v2534_v1 = vadd.f32 %v929_v63, %v881_v62 }
 0x201   : > { %v911_v3 = vpop.f32.mrf.mxu1  ;;  %v882_v5 = vpop.f32.mrf.mxu2 }
 0x202   : > { %v912_v4 = vadd.f32 %v911_v3, %v863_v2  ;;  %v883_v6 = vadd.f32 %v1946_v8, %v882_v5 }
 0x204   : > { %937 = sbr.rel (%p1577_p13) target bundleno = 533 (0x215), region = 56 }
 0x207   : > { %v931_v7 = vpop.f32.mrf.mxu3 }
 0x208   : > { %v2536_v9 = vadd.f32 %v931_v7, %v883_v6 }
 0x209   : > { %v938_v10 = vmax.f32 %v2508_v12, 0.0  ;;  %v939_v11 = vmax.f32 %v2512_v20, 0.0  ;;  %v940_v13 = vmax.f32 %v2516_v28, 0.0  ;;  %v941_v14 = vmax.f32 %v2520_v36, 0.0 }
 0x20a   : > { %v942_v15 = vmax.f32 %v2524_v44, 0.0  ;;  %v943_v8 = vmax.f32 %v2528_v52, 0.0  ;;  %v944_v16 = vmax.f32 %v2532_v60, 0.0  ;;  %v945_v18 = vmax.f32 %v912_v4, 0.0 }
 0x20b   : > { %v1729_v19 = vpack.c.bf16 %v939_v11, %v938_v10  ;;  %v1734_v21 = vpack.c.bf16 %v941_v14, %v940_v13  ;;  %v946_v22 = vmax.f32 %v2510_v17, 0.0  ;;  %v947_v23 = vmax.f32 %v2514_v25, 0.0 }
 0x20c   : > { %v1739_v24 = vpack.c.bf16 %v943_v8, %v942_v15  ;;  %v1744_v26 = vpack.c.bf16 %v945_v18, %v944_v16  ;;  %v948_v27 = vmax.f32 %v2518_v33, 0.0  ;;  %v949_v29 = vmax.f32 %v2522_v41, 0.0 }
 0x20d   : > { %1730 = vst [vmem:[%s971_s13] sm:$0xff] %v1729_v19   ;;  %v1749_v30 = vpack.c.bf16 %v947_v23, %v946_v22  ;;  %v950_v31 = vmax.f32 %v2526_v49, 0.0  ;;  %v951_v32 = vmax.f32 %v2530_v57, 0.0  ;;  %v952_v34 = vmax.f32 %v2534_v1, 0.0 }
 0x20e   : > { %1781 = vst [vmem:[%s971_s13 + $0x8] sm:$0xff] %v1734_v21   ;;  %v1754_v35 = vpack.c.bf16 %v949_v29, %v948_v27  ;;  %v953_v37 = vmax.f32 %v2536_v9, 0.0 }
 0x20f   : > { %1782 = vst [vmem:[%s971_s13 + $0x10] sm:$0xff] %v1739_v24   ;;  %v1759_v38 = vpack.c.bf16 %v951_v32, %v950_v31 }
 0x210   : > { %1783 = vst [vmem:[%s971_s13 + $0x18] sm:$0xff] %v1744_v26   ;;  %v1764_v39 = vpack.c.bf16 %v953_v37, %v952_v34 }
 0x211   : > { %1784 = vst [vmem:[%s971_s13 + $0x20] sm:$0xff] %v1749_v30  }
 0x212   : > { %1785 = vst [vmem:[%s971_s13 + $0x28] sm:$0xff] %v1754_v35  }
 0x213   : > { %1786 = vst [vmem:[%s971_s13 + $0x30] sm:$0xff] %v1759_v38  }
 0x214   : > { %1787 = vst [vmem:[%s971_s13 + $0x38] sm:$0xff] %v1764_v39  }
 0x215 PF: > { %p1579_p0 = scmp.ne.s32.totalorder %s2253_s22, 2 }
 0x217   : > { %991 = sbr.rel (%p1579_p0) target bundleno = 846 (0x34e), region = 60 }
 0x21c   : > { %v992_v40 = vlaneseq }
 0x21e   : > { %v993_v42 = vand.u32 127, %v992_v40 }
 0x220   : > { %vm994_vm0 = vcmp.lt.s32.totalorder %v993_v42, 8 }
 0x221   : > { %v2559_v43 = vsel %vm994_vm0, %v2524_v44, -1e+30  ;;  %v2563_v45 = vsel %vm994_vm0, %v2516_v28, -1e+30  ;;  %v2567_v46 = vsel %vm994_vm0, %v2508_v12, -1e+30 }
 0x222   : > { %1019 = vmax.xlane.f32.xlu2 %v2559_v43  ;;  %1015 = vmax.xlane.f32.xlu1 %v2563_v45  ;;  %v2574_v47 = vsel %vm994_vm0, %v2528_v52, -1e+30  ;;  %v2578_v44 = vsel %vm994_vm0, %v2520_v36, -1e+30  ;;  %v2582_v28 = vsel %vm994_vm0, %v2512_v20, -1e+30 }
 0x223   : > { %1011 = vmax.xlane.f32.xlu0 %v2567_v46  ;;  %v2589_v12 = vsel %vm994_vm0, %v2510_v17, -1e+30  ;;  %v2592_v48 = vsel %vm994_vm0, %v912_v4, -1e+30  ;;  %v2596_v36 = vsel %vm994_vm0, %v2532_v60, -1e+30 }
 0x224   : > { %v2603_v20 = vsel %vm994_vm0, %v2522_v41, -1e+30  ;;  %v2607_v17 = vsel %vm994_vm0, %v2518_v33, -1e+30  ;;  %v2611_v50 = vsel %vm994_vm0, %v2514_v25, -1e+30 }
 0x225   : > { %v2618_v51 = vsel %vm994_vm0, %v2534_v1, -1e+30  ;;  %v2622_v41 = vsel %vm994_vm0, %v2530_v57, -1e+30  ;;  %v2626_v33 = vsel %vm994_vm0, %v2526_v49, -1e+30 }
 0x226   : > { %v2633_v25 = vsel %vm994_vm0, %v2536_v9, -1e+30 }
 0x22a   : > { %1021 = vmax.xlane.f32.xlu2 %v2574_v47  ;;  %1017 = vmax.xlane.f32.xlu1 %v2578_v44 }
 0x22b   : > { %1013 = vmax.xlane.f32.xlu0 %v2582_v28 }
 0x232   : > { %1027 = vmax.xlane.f32.xlu2 %v2589_v12  ;;  %1025 = vmax.xlane.f32.xlu1 %v2592_v48 }
 0x233   : > { %1023 = vmax.xlane.f32.xlu0 %v2596_v36 }
 0x23a   : > { %1033 = vmax.xlane.f32.xlu2 %v2603_v20  ;;  %1031 = vmax.xlane.f32.xlu1 %v2607_v17 }
 0x23b   : > { %1029 = vmax.xlane.f32.xlu0 %v2611_v50 }
 0x242   : > { %1039 = vmax.xlane.f32.xlu2 %v2618_v51  ;;  %1037 = vmax.xlane.f32.xlu1 %v2622_v41 }
 0x243   : > { %1035 = vmax.xlane.f32.xlu0 %v2626_v33 }
 0x24b   : > { %1041 = vmax.xlane.f32.xlu0 %v2633_v25 }
 0x295   : > { %v2636_v52 = vpop.xlane.xlu2 %1019  ;;  %v2638_v53 = vpop.xlane.xlu1 %1015 }
 0x296   : > { %v1045_v49 = vsub.f32 %v2563_v45, %v2638_v53  ;;  %v2642_v54 = vpop.xlane.xlu0 %1011  ;;  %v1047_v5 = vsub.f32 %v2559_v43, %v2636_v52 }
 0x297   : > { %v1043_v55 = vsub.f32 %v2567_v46, %v2642_v54 }
 0x298   : > { %v1063_v56 = vmul.f32 1.442695, %v1045_v49  ;;  %v1067_v14 = vmul.f32 1.442695, %v1047_v5 }
 0x299   : > { %v1059_v57 = vmul.f32 1.442695, %v1043_v55 }
 0x29a   : > { %1947 = vpow2.f32 %v1063_v56 }
 0x29b   : > { %1949 = vpow2.f32 %v1059_v57 }
 0x29d   : > { %v2646_v58 = vpop.xlane.xlu2 %1021  ;;  %v2648_v59 = vpop.xlane.xlu1 %1017 }
 0x29e   : > { %v1048_v60 = vsub.f32 %v2574_v47, %v2646_v58  ;;  %v1046_v61 = vsub.f32 %v2578_v44, %v2648_v59  ;;  %v2654_v62 = vpop.xlane.xlu0 %1013 }
 0x29f   : > { %v1044_v63 = vsub.f32 %v2582_v28, %v2654_v62 }
 0x2a0   : > { %v1069_v0 = vmul.f32 1.442695, %v1048_v60  ;;  %v1065_v1 = vmul.f32 1.442695, %v1046_v61  ;;  %v1948_v2 = vpop.eup %1947 }
 0x2a1   : > { %v1061_v3 = vmul.f32 1.442695, %v1044_v63  ;;  %v1950_v4 = vpop.eup %1949  ;;  %1095 = vadd.xlane.f32.xlu0 %v1948_v2 }
 0x2a2   : > { %1951 = vpow2.f32 %v1069_v0  ;;  %1091 = vadd.xlane.f32.xlu1 %v1950_v4 }
 0x2a3   : > { %1953 = vpow2.f32 %v1065_v1 }
 0x2a4   : > { %1955 = vpow2.f32 %v1061_v3 }
 0x2a5   : > { %v2660_v6 = vpop.xlane.xlu2 %1027  ;;  %v2662_v7 = vpop.xlane.xlu1 %1025 }
 0x2a6   : > { %v1051_v9 = vsub.f32 %v2589_v12, %v2660_v6  ;;  %v2666_v10 = vpop.xlane.xlu0 %1023  ;;  %v1050_v18 = vsub.f32 %v2592_v48, %v2662_v7 }
 0x2a7   : > { %v1049_v11 = vsub.f32 %v2596_v36, %v2666_v10 }
 0x2a8   : > { %v1952_v13 = vpop.eup %1951  ;;  %v1075_v15 = vmul.f32 1.442695, %v1051_v9  ;;  %v1073_v22 = vmul.f32 1.442695, %v1050_v18 }
 0x2a9   : > { %v1954_v8 = vpop.eup %1953  ;;  %v1071_v16 = vmul.f32 1.442695, %v1049_v11  ;;  %1101 = vadd.xlane.f32.xlu0 %v1952_v13 }
 0x2aa   : > { %v1956_v19 = vpop.eup %1955  ;;  %1957 = vpow2.f32 %v1075_v15  ;;  %1097 = vadd.xlane.f32.xlu1 %v1954_v8 }
 0x2ab   : > { %1959 = vpow2.f32 %v1071_v16  ;;  %1093 = vadd.xlane.f32.xlu2 %v1956_v19 }
 0x2ac   : > { %1961 = vpow2.f32 %v1067_v14 }
 0x2ad   : > { %v2672_v21 = vpop.xlane.xlu2 %1033  ;;  %v2674_v23 = vpop.xlane.xlu1 %1031  ;;  %1963 = vpow2.f32 %v1073_v22 }
 0x2ae   : > { %v1054_v24 = vsub.f32 %v2603_v20, %v2672_v21  ;;  %v2678_v26 = vpop.xlane.xlu0 %1029  ;;  %v1053_v34 = vsub.f32 %v2607_v17, %v2674_v23 }
 0x2af   : > { %v1052_v27 = vsub.f32 %v2611_v50, %v2678_v26 }
 0x2b0   : > { %v1958_v29 = vpop.eup %1957  ;;  %v1081_v30 = vmul.f32 1.442695, %v1054_v24  ;;  %v1079_v38 = vmul.f32 1.442695, %v1053_v34 }
 0x2b1   : > { %v1960_v31 = vpop.eup %1959  ;;  %v1077_v32 = vmul.f32 1.442695, %v1052_v27  ;;  %1107 = vadd.xlane.f32.xlu0 %v1958_v29 }
 0x2b2   : > { %v1962_v35 = vpop.eup %1961  ;;  %1965 = vpow2.f32 %v1081_v30  ;;  %1103 = vadd.xlane.f32.xlu1 %v1960_v31 }
 0x2b3   : > { %1967 = vpow2.f32 %v1077_v32  ;;  %1099 = vadd.xlane.f32.xlu2 %v1962_v35  ;;  %v1964_v42 = vpop.eup %1963 }
 0x2b4   : > { %1969 = vpow2.f32 %v1079_v38 }
 0x2b5   : > { %v2684_v37 = vpop.xlane.xlu2 %1039  ;;  %v2692_v55 = vpop.xlane.xlu1 %1037 }
 0x2b6   : > { %v1057_v39 = vsub.f32 %v2618_v51, %v2684_v37  ;;  %v2688_v40 = vpop.xlane.xlu0 %1035  ;;  %v1056_v63 = vsub.f32 %v2622_v41, %v2692_v55 }
 0x2b7   : > { %v1055_v49 = vsub.f32 %v2626_v33, %v2688_v40 }
 0x2b8   : > { %v1966_v56 = vpop.eup %1965  ;;  %v1087_v57 = vmul.f32 1.442695, %v1057_v39  ;;  %v1085_v0 = vmul.f32 1.442695, %v1056_v63 }
 0x2b9   : > { %v1968_v60 = vpop.eup %1967  ;;  %v1083_v61 = vmul.f32 1.442695, %v1055_v49  ;;  %1113 = vadd.xlane.f32.xlu0 %v1966_v56 }
 0x2ba   : > { %1971 = vpow2.f32 %v1087_v57  ;;  %1109 = vadd.xlane.f32.xlu1 %v1968_v60  ;;  %v1970_v2 = vpop.eup %1969 }
 0x2bb   : > { %1973 = vpow2.f32 %v1083_v61  ;;  %1105 = vadd.xlane.f32.xlu2 %v1964_v42 }
 0x2bc   : > { %1975 = vpow2.f32 %v1085_v0 }
 0x2be   : > { %v2696_v1 = vpop.xlane.xlu0 %1041 }
 0x2bf   : > { %v1058_v3 = vsub.f32 %v2633_v25, %v2696_v1 }
 0x2c0   : > { %v1972_v4 = vpop.eup %1971 }
 0x2c1   : > { %v1974_v5 = vpop.eup %1973  ;;  %v1089_v9 = vmul.f32 1.442695, %v1058_v3  ;;  %1119 = vadd.xlane.f32.xlu0 %v1972_v4 }
 0x2c2   : > { %1115 = vadd.xlane.f32.xlu1 %v1974_v5  ;;  %v1976_v11 = vpop.eup %1975 }
 0x2c3   : > { %1977 = vpow2.f32 %v1089_v9  ;;  %1111 = vadd.xlane.f32.xlu2 %v1970_v2 }
 0x2c9   : > { %v1978_v13 = vpop.eup %1977 }
 0x2ca   : > { %1121 = vadd.xlane.f32.xlu1 %v1978_v13 }
 0x2cb   : > { %1117 = vadd.xlane.f32.xlu2 %v1976_v11 }
 0x314   : > { %v1096_v14 = vpop.xlane.xlu0 %1095 }
 0x315   : > { %v1092_v15 = vpop.xlane.xlu1 %1091  ;;  %1979 = vlog2.f32 %v1096_v14 }
 0x316   : > { %1981 = vlog2.f32 %v1092_v15 }
 0x31b   : > { %v1980_v8 = vpop.eup %1979 }
 0x31c   : > { %v1982_v16 = vpop.eup %1981  ;;  %v1128_v18 = vmul.f32 0.6931472, %v1980_v8  ;;  %v1102_v19 = vpop.xlane.xlu0 %1101 }
 0x31d   : > { %v1124_v22 = vmul.f32 0.6931472, %v1982_v16  ;;  %v1098_v24 = vpop.xlane.xlu1 %1097  ;;  %1983 = vlog2.f32 %v1102_v19 }
 0x31e   : > { %v1094_v27 = vpop.xlane.xlu2 %1093  ;;  %v1157_v29 = vadd.f32 %v1128_v18, %v2638_v53  ;;  %1985 = vlog2.f32 %v1098_v24 }
 0x31f   : > { %v1155_v30 = vadd.f32 %v1124_v22, %v2642_v54  ;;  %1987 = vlog2.f32 %v1094_v27 }
 0x320   : > { %v1173_v31 = vsub.f32 %v2563_v45, %v1157_v29 }
 0x321   : > { %v1171_v32 = vsub.f32 %v2567_v46, %v1155_v30 }
 0x322   : > { %1189 = vst [vmem:[%s2459_s29 + $0x10] sm:$0xff] %v1173_v31 }
 0x323   : > { %v1984_v34 = vpop.eup %1983  ;;  %1187 = vst [vmem:[%s2459_s29] sm:$0xff] %v1171_v32 }
 0x324   : > { %v1986_v35 = vpop.eup %1985  ;;  %v1134_v38 = vmul.f32 0.6931472, %v1984_v34  ;;  %v1108_v39 = vpop.xlane.xlu0 %1107 }
 0x325   : > { %v1988_v42 = vpop.eup %1987  ;;  %v1130_v49 = vmul.f32 0.6931472, %v1986_v35  ;;  %v1104_v53 = vpop.xlane.xlu1 %1103  ;;  %1989 = vlog2.f32 %v1108_v39 }
 0x326   : > { %v1100_v56 = vpop.xlane.xlu2 %1099  ;;  %v1126_v54 = vmul.f32 0.6931472, %v1988_v42  ;;  %v1160_v57 = vadd.f32 %v1134_v38, %v2646_v58 }
 0x327   : > { %1991 = vlog2.f32 %v1100_v56  ;;  %v1158_v45 = vadd.f32 %v1130_v49, %v2648_v59 }
 0x328   : > { %1993 = vlog2.f32 %v1104_v53  ;;  %v1156_v46 = vadd.f32 %v1126_v54, %v2654_v62  ;;  %v1176_v60 = vsub.f32 %v2574_v47, %v1160_v57 }
 0x329   : > { %v1174_v61 = vsub.f32 %v2578_v44, %v1158_v45 }
 0x32a   : > { %v1172_v63 = vsub.f32 %v2582_v28, %v1156_v46  ;;  %1192 = vst [vmem:[%s2459_s29 + $0x28] sm:$0xff] %v1176_v60 }
 0x32b   : > { %v1990_v0 = vpop.eup %1989  ;;  %1190 = vst [vmem:[%s2459_s29 + $0x18] sm:$0xff] %v1174_v61 }
 0x32c   : > { %1188 = vst [vmem:[%s2459_s29 + $0x8] sm:$0xff] %v1172_v63  ;;  %v1140_v3 = vmul.f32 0.6931472, %v1990_v0  ;;  %v1114_v58 = vpop.xlane.xlu0 %1113 }
 0x32d   : > { %v1992_v2 = vpop.eup %1991  ;;  %v1110_v62 = vpop.xlane.xlu1 %1109  ;;  %1995 = vlog2.f32 %v1114_v58 }
 0x32e   : > { %v1994_v4 = vpop.eup %1993  ;;  %v1132_v59 = vmul.f32 0.6931472, %v1992_v2  ;;  %v1106_v5 = vpop.xlane.xlu2 %1105  ;;  %v1163_v44 = vadd.f32 %v1140_v3, %v2660_v6 }
 0x32f   : > { %v1136_v47 = vmul.f32 0.6931472, %v1994_v4  ;;  %1997 = vlog2.f32 %v1106_v5 }
 0x330   : > { %v1159_v28 = vadd.f32 %v1132_v59, %v2636_v52  ;;  %1999 = vlog2.f32 %v1110_v62  ;;  %v1179_v11 = vsub.f32 %v2589_v12, %v1163_v44 }
 0x331   : > { %v1161_v9 = vadd.f32 %v1136_v47, %v2666_v10 }
 0x332   : > { %v1175_v13 = vsub.f32 %v2559_v43, %v1159_v28  ;;  %1195 = vst [vmem:[%s2459_s29 + $0x40] sm:$0xff] %v1179_v11 }
 0x333   : > { %v1177_v14 = vsub.f32 %v2596_v36, %v1161_v9  ;;  %v1996_v15 = vpop.eup %1995 }
 0x334   : > { %1191 = vst [vmem:[%s2459_s29 + $0x20] sm:$0xff] %v1175_v13  ;;  %v1146_v16 = vmul.f32 0.6931472, %v1996_v15  ;;  %v1120_v6 = vpop.xlane.xlu0 %1119 }
 0x335   : > { %v1998_v8 = vpop.eup %1997  ;;  %1193 = vst [vmem:[%s2459_s29 + $0x30] sm:$0xff] %v1177_v14  ;;  %v1116_v10 = vpop.xlane.xlu1 %1115  ;;  %2001 = vlog2.f32 %v1120_v6 }
 0x336   : > { %v2000_v18 = vpop.eup %1999  ;;  %v1138_v52 = vmul.f32 0.6931472, %v1998_v8  ;;  %v1112_v19 = vpop.xlane.xlu2 %1111  ;;  %v1166_v43 = vadd.f32 %v1146_v16, %v2672_v21 }
 0x337   : > { %v1142_v12 = vmul.f32 0.6931472, %v2000_v18  ;;  %2003 = vlog2.f32 %v1112_v19 }
 0x338   : > { %v1162_v36 = vadd.f32 %v1138_v52, %v2662_v7  ;;  %2005 = vlog2.f32 %v1116_v10  ;;  %v1182_v24 = vsub.f32 %v2603_v20, %v1166_v43 }
 0x339   : > { %v1164_v22 = vadd.f32 %v1142_v12, %v2678_v26 }
 0x33a   : > { %v1178_v27 = vsub.f32 %v2592_v48, %v1162_v36  ;;  %1198 = vst [vmem:[%s2459_s29 + $0x58] sm:$0xff] %v1182_v24 }
 0x33b   : > { %v1180_v29 = vsub.f32 %v2611_v50, %v1164_v22  ;;  %v2002_v30 = vpop.eup %2001 }
 0x33c   : > { %1194 = vst [vmem:[%s2459_s29 + $0x38] sm:$0xff] %v1178_v27  ;;  %v1152_v21 = vmul.f32 0.6931472, %v2002_v30 }
 0x33d   : > { %v2004_v31 = vpop.eup %2003  ;;  %1196 = vst [vmem:[%s2459_s29 + $0x48] sm:$0xff] %v1180_v29  ;;  %v1122_v35 = vpop.xlane.xlu1 %1121 }
 0x33e   : > { %v2006_v32 = vpop.eup %2005  ;;  %v1144_v7 = vmul.f32 0.6931472, %v2004_v31  ;;  %v1118_v34 = vpop.xlane.xlu2 %1117  ;;  %v1169_v20 = vadd.f32 %v1152_v21, %v2684_v37 }
 0x33f   : > { %v1148_v26 = vmul.f32 0.6931472, %v2006_v32  ;;  %2007 = vlog2.f32 %v1118_v34 }
 0x340   : > { %v1165_v48 = vadd.f32 %v1144_v7, %v2674_v23  ;;  %2009 = vlog2.f32 %v1122_v35  ;;  %v1185_v38 = vsub.f32 %v2618_v51, %v1169_v20 }
 0x341   : > { %v1167_v50 = vadd.f32 %v1148_v26, %v2688_v40 }
 0x342   : > { %v1181_v39 = vsub.f32 %v2607_v17, %v1165_v48  ;;  %1201 = vst [vmem:[%s2459_s29 + $0x70] sm:$0xff] %v1185_v38 }
 0x343   : > { %v1183_v42 = vsub.f32 %v2626_v33, %v1167_v50 }
 0x344   : > { %1197 = vst [vmem:[%s2459_s29 + $0x50] sm:$0xff] %v1181_v39 }
 0x345   : > { %v2008_v49 = vpop.eup %2007  ;;  %1199 = vst [vmem:[%s2459_s29 + $0x60] sm:$0xff] %v1183_v42 }
 0x346   : > { %v2010_v56 = vpop.eup %2009  ;;  %v1150_v37 = vmul.f32 0.6931472, %v2008_v49 }
 0x347   : > { %v1154_v53 = vmul.f32 0.6931472, %v2010_v56 }
 0x348   : > { %v1168_v23 = vadd.f32 %v1150_v37, %v2692_v55 }
 0x349   : > { %v1170_v54 = vadd.f32 %v1154_v53, %v2696_v1 }
 0x34a   : > { %v1184_v40 = vsub.f32 %v2622_v41, %v1168_v23 }
 0x34b   : > { %v1186_v57 = vsub.f32 %v2633_v25, %v1170_v54 }
 0x34c   : > { %1200 = vst [vmem:[%s2459_s29 + $0x68] sm:$0xff] %v1184_v40 }
 0x34d   : > { %1202 = vst [vmem:[%s2459_s29 + $0x78] sm:$0xff] %v1186_v57 }
 0x34e PF: > { %s1215_s6 = scalar_lea.hbm %s2806_s4, %s2437_s27  ;;  %s1216_s5 = sshll.u32 %s2459_s29, 4  ;;  %s1217_s5 = int_to_ptr.vmem [resolvable:$true] %s1216_s5 }
 0x34f   : > { %s1218_s8 = sshll.u32 %s1215_s6, 4  ;;  %s1204_s30 = scalar_lea.sflag [#allocation8], %s210_s9  ;;  %s1219_s8 = int_to_ptr.hbm [resolvable:$true] %s1218_s8 }
 0x350   : > { %s2145_s7 = sshra.s32 %s1219_s8, 4  ;;  %s2151_s18 = scalar_lea.hbm %s2806_s4, 256  ;;  %s2146_s7 = int_to_ptr.hbm [resolvable:$true] %s2145_s7 }
 0x351   : > { %s2147_s20 = scalar_lea.hbm %s2146_s7, 128  ;;  %p2152_p6 = scmp.lt.s32.totalorder %s2146_s7, %s2806_s4 }
 0x352   : > { %p2148_p1 = scmp.ne.s32.totalorder %s2146_s7, %s2147_s20  ;;  %p2153_p8 = scmp.lt.s32.totalorder %s2151_s18, %s2147_s20 }
 0x354   : > { %p2149_p4 = pnand %p2148_p1, %p2386_p12  ;;  %p2154_p3 = por %p2153_p8, %p2152_p6 }
 0x356   : > { %p2150_p5 = pneg %p2149_p4 }
 0x358   : > { %p2155_p9 = pnand %p2154_p3, %p2150_p5 }
 0x35a   : > { %2158 = shalt.err (!%p2155_p9)
}
 0x35b   : > { %s2271_s9 = smov 128   ;;  %s2272_s27 = smov 8  }
 0x35c   : > { %1837 = dma.vmem_to_hbm [thread:$0]  (%p2386_p12), %s1217_s5, 2048, %s1219_s8, %s1204_s30, %s2271_s9, %s2271_s9, %s2272_s27  }
 0x35d PF: > { %p1851_p10 = scmp.ge.s32.totalorder %s2265_s25, 2  ;;  %s1233_s29 = sand.u32 1, %s2225_s15  }
 0x35e   : > { %s1234_s2 = scalar_lea.sflag [#allocation8], %s1233_s29 }
 0x35f   : > { %p1847_p7 = pnand %p1851_p10, %p2394_p2 }
 0x361   : > { %p1848_p11 = pneg %p1847_p7 }
 0x363   : > { %2220 = dma.done.wait (%p1848_p11), %s1234_s2, 2048  }
 0x364   : > { %2222 = vsyncadd (%p1848_p11), %s1234_s2, 4294965248  ;;  %s23_s25 = sadd.s32 1, %s2265_s25   ;;  %s2824_s12 = sld [smem:[#allocation23_spill]] }
 0x365   : > { %p20_p13 = scmp.ge.s32.totalorder %s23_s25, 8   ;;  %s2825_s20 = sld [smem:[#allocation27_spill]] }
 0x366   : > { %s2826_s21 = sld [smem:[#allocation24_spill]]  ;;  %s2829_s15 = smov %s2229_s16 }
 0x367   : > { %s2827_s23 = sld [smem:[#allocation25_spill]]  ;;  %s2830_s16 = smov %s2233_s17 }
 0x368   : > { %s2828_s13 = sld [smem:[#allocation26_spill]]  ;;  %s2831_s17 = smov %s2381_s10 }
 0x369   : > { %s2832_s18 = smov %s2241_s19  ;;  %s2834_s22 = smov %s2261_s24 }
 0x36a   : > { %s2833_s19 = smov %s2824_s12  ;;  %22 = sbr.rel (!%p20_p13) target bundleno = 13 (0xd), region = 114 }
 0x36e   : > { %s2835_s24 = smov %s2828_s13 }
 0x36f   :  { %1240 = vsyncpa [#allocation7], 1 }
 0x370   :  { %1242 = vsyncpa [#allocation7 + $0x1], 1 }
 0x371   :  { %1243 = vsyncpa [#allocation10], 1 }
 0x372   :  { %1245 = vsyncpa [#allocation10 + $0x1], 1 }
 0x373   :  { %1246 = vsyncpa [#allocation8], 1 }
 0x374   :  { %1248 = vsyncpa [#allocation8 + $0x1], 1 }
 0x375   :  { %1249 = vsyncmov [#allocation5] }
 0x378   :  { %s1250_s10 = vpop.sfrf %1249 }
 0x379   :  { %p1585_p12 = scmp.ne.s32.totalorder %s1250_s10, 0 }
 0x37b   :  { %1254 = shalt.err (%p1585_p12)  }
 0x37c   :  { %1256 = vsyncmov [#allocation5 + $0x1] }
 0x37f   :  { %s1257_s14 = vpop.sfrf %1256 }
 0x380   :  { %p1586_p2 = scmp.ne.s32.totalorder %s1257_s14, 0 }
 0x382   :  { %1261 = shalt.err (%p1586_p2)  }

</bundles_post_ra>
